<compile_context>
chip_gen: v7x
topology: tpu7x:2x2x1
jax: 0.10.0
libtpu: 0.0.40
codegen_flags: <defaults>
</compile_context>

<pallas_src>
import math

import jax
import jax.numpy as jnp
import numpy as np
from jax.experimental import pallas as pl
from jax.experimental.pallas import tpu as pltpu

F32 = jnp.float32
BF16 = jnp.bfloat16

HIDDEN = 512          # hidden_size == bi_hidden_size == all_head_size
NUM_HEADS = 8


# ---------------------------------------------------------------------------
# Pallas kernel: one folded linear per grid step (grid axis = side 1 / side 2)
# ---------------------------------------------------------------------------
def _co_self_attention_kernel(x_ref, w_ref, b_ref, o_ref):
    # x_ref: (1, B, D)   w_ref: (1, D, D) bf16   b_ref: (1, 1, D) f32
    x = x_ref[0].astype(w_ref.dtype)                               # (B, D) bf16
    o_ref[0] = (jnp.dot(x, w_ref[0], preferred_element_type=jnp.float32)
                + b_ref[0]).astype(o_ref.dtype)


def co_self_attention(kernel_params, x1, x2):
    """Eval-mode CoSelfAttention.forward(x1, x2) -> (out1, out2).

    kernel_params = (w_packed (2,D,D) bf16, b_packed (2,1,D) f32) with the
    value/output projections pre-folded (see prepare_kernel_params).
    """
    w_packed, b_packed = kernel_params
    b, d = x1.shape
    assert x1.ndim == 2 and x2.shape == (b, d) and d == w_packed.shape[-1], \
        "contract: 2-D (B, hidden) inputs only (seq_len == 1, eval mode)"

    x = jnp.stack([x1, x2], axis=0)                                # (2, B, D)
    out = pl.pallas_call(
        _co_self_attention_kernel,
        out_shape=jax.ShapeDtypeStruct((2, b, d), F32),
        grid=(2,),
        in_specs=[pl.BlockSpec((1, b, d), lambda s: (s, 0, 0)),
                  pl.BlockSpec((1, d, d), lambda s: (s, 0, 0)),
                  pl.BlockSpec((1, 1, d), lambda s: (s, 0, 0))],
        out_specs=pl.BlockSpec((1, b, d), lambda s: (s, 0, 0)),
        compiler_params=pltpu.CompilerParams(
            dimension_semantics=("parallel",),   # sides split across TCs on v7x
            vmem_limit_bytes=8 << 20),
    )(x, w_packed, b_packed)
    return out[0], out[1]


# ---------------------------------------------------------------------------
# Parameter prep: fold  W' = Wv @ Wo ,  b' = bv @ Wo + bo  per side and stack.
# ---------------------------------------------------------------------------
def prepare_kernel_params(p):
    wf1 = (p["wv1"] @ p["wo1"]).astype(BF16)
    wf2 = (p["wv2"] @ p["wo2"]).astype(BF16)
    bf1 = p["bv1"] @ p["wo1"] + p["bo1"]
    bf2 = p["bv2"] @ p["wo2"] + p["bo2"]
    w_packed = jnp.stack([wf1, wf2], axis=0)                       # (2, D, D) bf16
    b_packed = jnp.stack([bf1, bf2], axis=0).astype(F32)           # (2, 1, D) f32
    return w_packed, b_packed


# ---------------------------------------------------------------------------
# Pure-JAX reference: literal transcription of the PyTorch forward (eval mode),
# INCLUDING the degenerate q/k/softmax path, used to validate the fused kernel.
# ---------------------------------------------------------------------------
def co_self_attention_ref(p, x1, x2, num_heads=NUM_HEADS):
    b, d = x1.shape
    dh = d // num_heads

    def lin(x, w, bias):
        return x @ w + bias

    def heads(t):  # (B, D) -> (B, H, 1, dh)  == transpose_for_scores on (B, 1, D)
        return t.reshape(b, 1, num_heads, dh).transpose(0, 2, 1, 3)

    # match the kernel's bf16 rounding of the inputs so only matmul precision /
    # accumulation order and the bf16 folded-weight rounding differ
    x1 = x1.astype(BF16).astype(F32)
    x2 = x2.astype(BF16).astype(F32)

    q1 = heads(lin(x1, p["wq1"], p["bq1"]))
    k1 = heads(lin(x1, p["wk1"], p["bk1"]))
    v1 = heads(lin(x1, p["wv1"], p["bv1"]))
    q2 = heads(lin(x2, p["wq2"], p["bq2"]))
    k2 = heads(lin(x2, p["wk2"], p["bk2"]))
    v2 = heads(lin(x2, p["wv2"], p["bv2"]))

    s1 = q2 @ jnp.swapaxes(k1, -1, -2) / math.sqrt(dh)            # (B, H, 1, 1)
    ctx1 = (jax.nn.softmax(s1, axis=-1) @ v1).transpose(0, 2, 1, 3).reshape(b, d)
    s2 = q1 @ jnp.swapaxes(k2, -1, -2) / math.sqrt(dh)
    ctx2 = (jax.nn.softmax(s2, axis=-1) @ v2).transpose(0, 2, 1, 3).reshape(b, d)

    out1 = lin(ctx1, p["wo1"], p["bo1"])                           # dropout3: eval identity
    out2 = lin(ctx2, p["wo2"], p["bo2"])
    return out1, out2


# ---------------------------------------------------------------------------
# Deterministic parameter init (PyTorch nn.Linear default: U(+-1/sqrt(fan_in)));
# weights stored (in, out) so every layer is a plain x @ W + b.  All f32 masters.
# ---------------------------------------------------------------------------
def init_params(key, hidden=HIDDEN):
    names = ["q1", "k1", "v1", "q2", "k2", "v2", "o1", "o2"]
    bound = 1.0 / math.sqrt(hidden)
    p = {}
    for name, k in zip(names, jax.random.split(key, len(names))):
        kw, kb = jax.random.split(k)
        p["w" + name] = jax.random.uniform(kw, (hidden, hidden), F32, -bound, bound)
        p["b" + name] = jax.random.uniform(kb, (1, hidden), F32, -bound, bound)
    return p


if __name__ == "__main__":
    key = jax.random.PRNGKey(0)
    pkey, k1, k2 = jax.random.split(key, 3)
    params = init_params(pkey)
    kernel_params = prepare_kernel_params(params)   # folded + packed (offline)

    batch = 4
    x1 = jax.random.normal(k1, (batch, HIDDEN), F32)
    x2 = jax.random.normal(k2, (batch, HIDDEN), F32)

    fwd = jax.jit(co_self_attention)
    out1, out2 = fwd(kernel_params, x1, x2)
    jax.block_until_ready((out1, out2))

    assert out1.shape == (batch, HIDDEN) and out2.shape == (batch, HIDDEN)

    ref1, ref2 = co_self_attention_ref(params, x1, x2)
    np.testing.assert_allclose(np.asarray(out1), np.asarray(ref1), rtol=2e-2, atol=2e-2)
    np.testing.assert_allclose(np.asarray(out2), np.asarray(ref2), rtol=2e-2, atol=2e-2)

    print("KERNEL_OK")
</pallas_src>

<mosaic_0001>
module attributes {stable_mosaic.version = 11 : i64} {
  func.func @_co_self_attention_kernel(%arg0: i32, %arg1: memref<1x4x512xf32, #tpu.memory_space<vmem>>, %arg2: memref<1x512x512xbf16, #tpu.memory_space<vmem>>, %arg3: memref<1x1x512xf32, #tpu.memory_space<vmem>>, %arg4: memref<1x4x512xf32, #tpu.memory_space<vmem>>) attributes {dimension_semantics = [#tpu.dimension_semantics<parallel>], iteration_bounds = array<i64: 2>, scalar_prefetch = 0 : i64, scratch_operands = 0 : i64, tpu.core_type = #tpu.core_type<tc>, window_params = [{transform_indices = @transform_0, window_bounds = array<i64: 1, 4, 512>}, {transform_indices = @transform_1, window_bounds = array<i64: 1, 512, 512>}, {transform_indices = @transform_2, window_bounds = array<i64: 1, 1, 512>}, {transform_indices = @transform_3, window_bounds = array<i64: 1, 4, 512>}]} {
    %c0 = arith.constant 0 : index
    %c0_0 = arith.constant 0 : index
    %c0_1 = arith.constant 0 : index
    %0 = vector.load %arg1[%c0, %c0_0, %c0_1] : memref<1x4x512xf32, #tpu.memory_space<vmem>>, vector<1x4x512xf32>
    %1 = vector.shape_cast %0 : vector<1x4x512xf32> to vector<4x512xf32>
    %2 = arith.truncf %1 : vector<4x512xf32> to vector<4x512xbf16>
    %c0_2 = arith.constant 0 : index
    %c0_3 = arith.constant 0 : index
    %c0_4 = arith.constant 0 : index
    %3 = vector.load %arg2[%c0_2, %c0_3, %c0_4] : memref<1x512x512xbf16, #tpu.memory_space<vmem>>, vector<1x512x512xbf16>
    %4 = vector.shape_cast %3 : vector<1x512x512xbf16> to vector<512x512xbf16>
    %cst = arith.constant dense<0.000000e+00> : vector<4x512xf32>
    %5 = tpu.matmul %2, %4, %cst {dimension_numbers = #tpu.dot_dimension_numbers<[1], [0], [0], [1], [0, 0, 1, 1], [], []>} : vector<4x512xbf16>, vector<512x512xbf16>, vector<4x512xf32> -> vector<4x512xf32>
    %c0_5 = arith.constant 0 : index
    %c0_6 = arith.constant 0 : index
    %c0_7 = arith.constant 0 : index
    %6 = vector.load %arg3[%c0_5, %c0_6, %c0_7] : memref<1x1x512xf32, #tpu.memory_space<vmem>>, vector<1x1x512xf32>
    %7 = vector.shape_cast %6 : vector<1x1x512xf32> to vector<1x512xf32>
    %8 = vector.broadcast %7 : vector<1x512xf32> to vector<4x512xf32>
    %9 = arith.addf %5, %8 : vector<4x512xf32>
    %c0_8 = arith.constant 0 : index
    %c0_9 = arith.constant 0 : index
    %c0_10 = arith.constant 0 : index
    %10 = vector.load %arg4[%c0_8, %c0_9, %c0_10] : memref<1x4x512xf32, #tpu.memory_space<vmem>>, vector<1x4x512xf32>
    %11 = vector.shape_cast %10 : vector<1x4x512xf32> to vector<4x512xf32>
    %12 = vector.shape_cast %9 : vector<4x512xf32> to vector<1x4x512xf32>
    tpu.vector_store %arg4[%c0_8, %c0_9, %c0_10], %12 {strides = array<i32>} : memref<1x4x512xf32, #tpu.memory_space<vmem>>, vector<1x4x512xf32>,
    return
  }
  func.func @transform_0(%arg0: i32) -> (i32, i32, i32) {
    %c0_i32 = arith.constant 0 : i32
    %c0_i32_0 = arith.constant 0 : i32
    %c0_i32_1 = arith.constant 0 : i32
    return %arg0, %c0_i32, %c0_i32_0 : i32, i32, i32
  }
  func.func @transform_1(%arg0: i32) -> (i32, i32, i32) {
    %c0_i32 = arith.constant 0 : i32
    %c0_i32_0 = arith.constant 0 : i32
    %c0_i32_1 = arith.constant 0 : i32
    return %arg0, %c0_i32, %c0_i32_0 : i32, i32, i32
  }
  func.func @transform_2(%arg0: i32) -> (i32, i32, i32) {
    %c0_i32 = arith.constant 0 : i32
    %c0_i32_0 = arith.constant 0 : i32
    %c0_i32_1 = arith.constant 0 : i32
    return %arg0, %c0_i32, %c0_i32_0 : i32, i32, i32
  }
  func.func @transform_3(%arg0: i32) -> (i32, i32, i32) {
    %c0_i32 = arith.constant 0 : i32
    %c0_i32_0 = arith.constant 0 : i32
    %c0_i32_1 = arith.constant 0 : i32
    return %arg0, %c0_i32, %c0_i32_0 : i32, i32, i32
  }
}

</mosaic_0001>

<bundles_post_ra>
// kernel: co_self_attention.1
= control target key start
LH: loop header
LB: loop body
LE: loop exit
PB: predicated region body
PF: predicated region fallthrough
CT: control target
= control target key end

     0   :  { %8 = vsyncpa [#allocation3], 0  ;;  %s2039_s0 = inlined_call_operand.vmem [shape: f32[2,4,512], index: 0, kind: input, shape index: {}]   ;;  %s2040_s1 = inlined_call_operand.hbm [shape: bf16[2,512,512], index: 1, kind: input, shape index: {}]   ;;  %s2041_s2 = inlined_call_operand.vmem [shape: f32[2,1,512], index: 2, kind: input, shape index: {}]   ;;  %s2042_s3 = inlined_call_operand.vmem [shape: f32[2,4,512], index: 3, kind: output, shape index: {}]  }
   0x1   :  { %10 = vsyncpa [#allocation3 + $0x1], 0  ;;  %s1777_s12 = smov 0   ;;  %s1779_s13 = smov 0  }
   0x2   :  { %s1781_s14 = smov 0   ;;  %s1783_s15 = smov 0  }
   0x3 LB: > { %s1796_s16 = sadd.s32 4294967295, %s1752_s15   ;;  %s1799_s17 = sadd.s32 1, %s1752_s15   ;;  %s1752_s15 = sphi %s1783_s15, %s2049_s15   ;;  %s1748_s14 = sphi %s1781_s14, %s2048_s14   ;;  %s1744_s13 = sphi %s1779_s13, %s2047_s13   ;;  %s1740_s12 = sphi %s1777_s12, %s2046_s12  }
   0x4   : > { %s46_s18 = ssub.s32 %s1752_s15, %s1799_s17  ;;  %s49_s19 = sadd.s32 1, %s1748_s14 }
   0x5   : > { %p47_p0 = scmp.eq.s32.totalorder %s46_s18, 0  ;;  %p56_p1 = scmp.ne.s32.totalorder %s1748_s14, %s1744_s13 }
   0x6   : > { %p57_p2 = scmp.eq.s32.totalorder %s1752_s15, 0  ;;  %p62_p3 = scmp.ne.s32.totalorder %s1744_s13, %s1740_s12 }
   0x7   : > { %s1809_s20 = scalar_select %p47_p0, %s1748_s14, %s49_s19  }
   0x8   : > { %p58_p4 = por %p57_p2, %p56_p1  ;;  %p63_p5 = scmp.eq.s32.totalorder %s1796_s16, 0 }
   0x9   : > { %p1459_p6 = scmp.lt.s32.totalorder %s1752_s15, 2  ;;  %s146_s22 = sand.u32 1, %s1748_s14  }
   0xa   : > { %p1813_p7 = por %p63_p5, %p62_p3  ;;  %s1298_s23 = sshll.u32 %s146_s22, 10 }
   0xb   : > { %s1438_s24 = sshll.u32 %s1752_s15, 14  ;;  %s150_s28 = scalar_lea.vmem [#allocation2], %s1298_s23 }
   0xc   : > { %s1822_s27 = scalar_lea.hbm %s2040_s1, %s1438_s24  ;;  %s157_s29 = sshll.u32 %s150_s28, 4  ;;  %s1824_s29 = int_to_ptr.vmem [resolvable:$true] %s157_s29 }
   0xd   : > { %p1826_p8 = pnand %p1459_p6, %p58_p4  ;;  %s1831_s4 = scalar_lea.sflag [#allocation3], %s146_s22 }
   0xe   : > { %s1688_s5 = scalar_lea.hbm %s1822_s27, 16384  ;;  %s1693_s8 = scalar_lea.hbm %s2040_s1, 32768 }
   0xf   : > { %p1689_p10 = scmp.ne.s32.totalorder %s1822_s27, %s1688_s5  ;;  %p1690_p11 = pneg %p1826_p8 }
  0x10   : > { %p1694_p0 = scmp.lt.u32.totalorder %s1822_s27, %s2040_s1  ;;  %p1695_p1 = scmp.lt.u32.totalorder %s1693_s8, %s1688_s5 }
  0x11   : > { %p1691_p12 = pnand %p1690_p11, %p1689_p10  ;;  %p1697_p3 = scmp.lt.u32.totalorder %s1688_s5, %s1822_s27 }
  0x12   : > { %p1696_p2 = por %p1695_p1, %p1694_p0 }
  0x13   : > { %p1692_p13 = pneg %p1691_p12 }
  0x14   : > { %p1698_p4 = por %p1697_p3, %p1696_p2 }
  0x16   : > { %p1699_p5 = pnand %p1698_p4, %p1692_p13 }
  0x18   : > { %1702 = shalt.err (!%p1699_p5)
}
  0x19   : > { %s1703_s11 = scalar_lea.vmem %s1824_s29, 16384  ;;  %s1754_s12 = smov [#allocation2]  }
  0x1a   : > { %p1704_p6 = scmp.ne.s32.totalorder %s1824_s29, %s1703_s11  ;;  %s1708_s18 = sshll.u32 %s1754_s12, 4  ;;  %s1709_s18 = int_to_ptr.vmem [resolvable:$false] %s1708_s18 }
  0x1b   : > { %s1710_s19 = scalar_lea.vmem %s1709_s18, 32768  ;;  %p1711_p9 = scmp.lt.s32.totalorder %s1824_s29, %s1709_s18 }
  0x1c   : > { %p1706_p10 = pnand %p1704_p6, %p1690_p11  ;;  %p1712_p0 = scmp.lt.s32.totalorder %s1710_s19, %s1703_s11 }
  0x1e   : > { %p1707_p12 = pneg %p1706_p10  ;;  %p1713_p1 = por %p1712_p0, %p1711_p9 }
  0x20   : > { %p1714_p2 = pnand %p1713_p1, %p1707_p12 }
  0x22   : > { %1717 = shalt.err (!%p1714_p2)
}
  0x23   : > { %s1755_s22 = smov 256   ;;  %s1756_s23 = smov 16  }
  0x24   : > { %1458 = dma.hbm_to_vmem [thread:$0]  (!%p1826_p8), %s1822_s27, 16384, %s1824_s29, %s1831_s4, %s1755_s22, %s1755_s22, %s1756_s23  }
  0x25   : > { %p172_p11 = scmp.lt.s32.totalorder %s1752_s15, 3  ;;  %p2045_p13 = scmp.ge.s32.totalorder %s1752_s15, 1 }
  0x27   : > { %p173_p3 = pnand %p2045_p13, %p172_p11 }
  0x28   : > { %s178_s24 = sand.u32 (!%p173_p3), 1, %s1744_s13  }
  0x29   : > { %176 = sbr.rel (%p173_p3) target bundleno = 396 (0x18c), region = 32  ;;  %s1302_s25 = sshll.u32 (!%p173_p3), %s178_s24, 10 }
  0x2a   : > { %s179_s26 = scalar_lea.sflag (!%p173_p3), [#allocation3], %s178_s24  ;;  %s1863_s28 = scalar_lea.vmem (!%p173_p3), [#allocation2], %s1302_s25 }
  0x30   : > { %1735 = dma.done.wait (%p1813_p7), %s179_s26, 16384  }
  0x31   : > { %1737 = vsyncadd (%p1813_p7), %s179_s26, 4294950912  ;;  %v1494_v0 = vld [vmem:[%s1863_s28 + $0x4] ss:$16 sps:$4 sm:$0xff]   ;;  %v1496_v1 = vld [vmem:[%s1863_s28 + $0xc] ss:$16 sps:$4 sm:$0xff]   ;;  %p214_p7 = scmp.lt.s32.totalorder %s1796_s16, 1 }
  0x32   : > { %1030 = vmatprep.subr.bf16.mxu0 %v1494_v0  ;;  %v1498_v2 = vld [vmem:[%s1863_s28] ss:$16 sps:$4 sm:$0xff]   ;;  %v1499_v3 = vld [vmem:[%s1863_s28 + $0x8] ss:$16 sps:$4 sm:$0xff]   ;;  %1112 = vmatprep.subr.bf16.mxu1 %v1496_v1  ;;  %v1500_v4 = vld [vmem:[%s1863_s28 + $0x24] ss:$16 sps:$4 sm:$0xff]  }
  0x33   : > { %1031 = vmatpush1.bf16.msra.mxu0 %v1498_v2  ;;  %1113 = vmatpush1.bf16.msra.mxu1 %v1499_v3  ;;  %v1502_v5 = vld [vmem:[%s1863_s28 + $0x2c] ss:$16 sps:$4 sm:$0xff]   ;;  %v1504_v6 = vld [vmem:[%s1863_s28 + $0x20] ss:$16 sps:$4 sm:$0xff]   ;;  %v1505_v7 = vld [vmem:[%s1863_s28 + $0x28] ss:$16 sps:$4 sm:$0xff]  }
  0x34   : > { %1032 = vmatprep.subr.bf16.mxu0 %v1500_v4  ;;  %1114 = vmatprep.subr.bf16.mxu1 %v1502_v5  ;;  %v1506_v8 = vld [vmem:[%s1863_s28 + $0x44] ss:$16 sps:$4 sm:$0xff]   ;;  %v1508_v9 = vld [vmem:[%s1863_s28 + $0x4c] ss:$16 sps:$4 sm:$0xff]   ;;  %v1510_v10 = vld [vmem:[%s1863_s28 + $0x40] ss:$16 sps:$4 sm:$0xff]  }
  0x35   : > { %v1511_v11 = vld [vmem:[%s1863_s28 + $0x48] ss:$16 sps:$4 sm:$0xff]   ;;  %v1512_v12 = vld [vmem:[%s1863_s28 + $0x64] ss:$16 sps:$4 sm:$0xff]   ;;  %v1514_v13 = vld [vmem:[%s1863_s28 + $0x6c] ss:$16 sps:$4 sm:$0xff]  }
  0x36   : > { %v1516_v14 = vld [vmem:[%s1863_s28 + $0x60] ss:$16 sps:$4 sm:$0xff]   ;;  %v1517_v15 = vld [vmem:[%s1863_s28 + $0x68] ss:$16 sps:$4 sm:$0xff]   ;;  %v1518_v16 = vld [vmem:[%s1863_s28 + $0x84] ss:$16 sps:$4 sm:$0xff]  }
  0x37   : > { %1033 = vmatpush1.bf16.msra.mxu0 %v1504_v6  ;;  %1115 = vmatpush1.bf16.msra.mxu1 %v1505_v7  ;;  %v1520_v17 = vld [vmem:[%s1863_s28 + $0x8c] ss:$16 sps:$4 sm:$0xff]   ;;  %v1522_v18 = vld [vmem:[%s1863_s28 + $0x80] ss:$16 sps:$4 sm:$0xff]   ;;  %v1523_v19 = vld [vmem:[%s1863_s28 + $0x88] ss:$16 sps:$4 sm:$0xff]  }
  0x38   : > { %1034 = vmatprep.subr.bf16.mxu0 %v1506_v8  ;;  %1116 = vmatprep.subr.bf16.mxu1 %v1508_v9  ;;  %v1524_v20 = vld [vmem:[%s1863_s28 + $0xa4] ss:$16 sps:$4 sm:$0xff]   ;;  %v1526_v21 = vld [vmem:[%s1863_s28 + $0xac] ss:$16 sps:$4 sm:$0xff]   ;;  %v1528_v22 = vld [vmem:[%s1863_s28 + $0xa0] ss:$16 sps:$4 sm:$0xff]  }
  0x39   : > { %v1529_v23 = vld [vmem:[%s1863_s28 + $0xa8] ss:$16 sps:$4 sm:$0xff]   ;;  %v1530_v24 = vld [vmem:[%s1863_s28 + $0xc4] ss:$16 sps:$4 sm:$0xff]   ;;  %v1532_v25 = vld [vmem:[%s1863_s28 + $0xcc] ss:$16 sps:$4 sm:$0xff]  }
  0x3a   : > { %v1534_v26 = vld [vmem:[%s1863_s28 + $0xc0] ss:$16 sps:$4 sm:$0xff]   ;;  %v1535_v27 = vld [vmem:[%s1863_s28 + $0xc8] ss:$16 sps:$4 sm:$0xff]   ;;  %v1536_v28 = vld [vmem:[%s1863_s28 + $0xe4] ss:$16 sps:$4 sm:$0xff]  }
  0x3b   : > { %1035 = vmatpush1.bf16.msra.mxu0 %v1510_v10  ;;  %1117 = vmatpush1.bf16.msra.mxu1 %v1511_v11  ;;  %v1538_v29 = vld [vmem:[%s1863_s28 + $0xec] ss:$16 sps:$4 sm:$0xff]   ;;  %v1540_v30 = vld [vmem:[%s1863_s28 + $0xe0] ss:$16 sps:$4 sm:$0xff]   ;;  %v1541_v31 = vld [vmem:[%s1863_s28 + $0xe8] ss:$16 sps:$4 sm:$0xff]  }
  0x3c   : > { %1036 = vmatprep.subr.bf16.mxu0 %v1512_v12  ;;  %1118 = vmatprep.subr.bf16.mxu1 %v1514_v13  ;;  %v1542_v32 = vld [vmem:[%s1863_s28 + $0x104] ss:$16 sps:$4 sm:$0xff]   ;;  %v1544_v33 = vld [vmem:[%s1863_s28 + $0x10c] ss:$16 sps:$4 sm:$0xff]   ;;  %v1546_v34 = vld [vmem:[%s1863_s28 + $0x100] ss:$16 sps:$4 sm:$0xff]  }
  0x3d   : > { %v1547_v35 = vld [vmem:[%s1863_s28 + $0x108] ss:$16 sps:$4 sm:$0xff]   ;;  %v1548_v36 = vld [vmem:[%s1863_s28 + $0x124] ss:$16 sps:$4 sm:$0xff]   ;;  %s2051_s16 = smov (!%p214_p7, %s1796_s16), 1 }
  0x3e   : > { %v1550_v37 = vld [vmem:[%s1863_s28 + $0x12c] ss:$16 sps:$4 sm:$0xff]   ;;  %v1552_v38 = vld [vmem:[%s1863_s28 + $0x120] ss:$16 sps:$4 sm:$0xff]   ;;  %v1553_v39 = vld [vmem:[%s1863_s28 + $0x128] ss:$16 sps:$4 sm:$0xff]  }
  0x3f   : > { %1037 = vmatpush1.bf16.msra.mxu0 %v1516_v14  ;;  %1119 = vmatpush1.bf16.msra.mxu1 %v1517_v15  ;;  %v1554_v40 = vld [vmem:[%s1863_s28 + $0x144] ss:$16 sps:$4 sm:$0xff]   ;;  %s1439_s15 = sshll.u32 %s2051_s16, 4  ;;  %v1556_v41 = vld [vmem:[%s1863_s28 + $0x14c] ss:$16 sps:$4 sm:$0xff]   ;;  %s1305_s30 = sshll.u32 %s2051_s16, 2 }
  0x40   : > { %1038 = vmatprep.subr.bf16.mxu0 %v1518_v16  ;;  %1120 = vmatprep.subr.bf16.mxu1 %v1520_v17  ;;  %v1558_v42 = vld [vmem:[%s1863_s28 + $0x140] ss:$16 sps:$4 sm:$0xff]   ;;  %v1559_v43 = vld [vmem:[%s1863_s28 + $0x148] ss:$16 sps:$4 sm:$0xff]   ;;  %s1923_s29 = scalar_lea.vmem %s2039_s0, %s1439_s15  ;;  %v1560_v44 = vld [vmem:[%s1863_s28 + $0x164] ss:$16 sps:$4 sm:$0xff]   ;;  %s222_s6 = scalar_lea.vmem %s2041_s2, %s1305_s30 }
  0x41   : > { %v1562_v45 = vld [vmem:[%s1863_s28 + $0x16c] ss:$16 sps:$4 sm:$0xff]   ;;  %v228_v46 = vld [vmem:[%s1923_s29] sm:$0xff]  ;;  %v1565_v49 = vld [vmem:[%s1863_s28 + $0x168] ss:$16 sps:$4 sm:$0xff]   ;;  %s227_s9 = scalar_lea.vmem %s2042_s3, %s1439_s15 }
  0x42   : > { %v232_v47 = vcombine.high %v228_v46, %v228_v46  ;;  %v1564_v48 = vld [vmem:[%s1863_s28 + $0x160] ss:$16 sps:$4 sm:$0xff]   ;;  %v1566_v50 = vld [vmem:[%s1863_s28 + $0x184] ss:$16 sps:$4 sm:$0xff]   ;;  %v1568_v51 = vld [vmem:[%s1863_s28 + $0x18c] ss:$16 sps:$4 sm:$0xff]   ;;  %v236_v7 = vpack.c.bf16 %v228_v46, %v228_v46 }
  0x43   : > { %1039 = vmatpush1.bf16.msra.mxu0 %v1522_v18  ;;  %1121 = vmatpush1.bf16.msra.mxu1 %v1523_v19  ;;  %v1570_v53 = vld [vmem:[%s1863_s28 + $0x180] ss:$16 sps:$4 sm:$0xff]   ;;  %v1571_v54 = vld [vmem:[%s1863_s28 + $0x188] ss:$16 sps:$4 sm:$0xff]   ;;  %v1572_v55 = vld [vmem:[%s1863_s28 + $0x1a4] ss:$16 sps:$4 sm:$0xff]  }
  0x44   : > { %1040 = vmatprep.subr.bf16.mxu0 %v1524_v20  ;;  %1122 = vmatprep.subr.bf16.mxu1 %v1526_v21  ;;  %v237_v52 = vpack.c.bf16 %v232_v47, %v232_v47  ;;  %v1574_v56 = vld [vmem:[%s1863_s28 + $0x1ac] ss:$16 sps:$4 sm:$0xff]   ;;  %v1576_v57 = vld [vmem:[%s1863_s28 + $0x1a0] ss:$16 sps:$4 sm:$0xff]   ;;  %v1577_v58 = vld [vmem:[%s1863_s28 + $0x1a8] ss:$16 sps:$4 sm:$0xff]  }
  0x45   : > { %v1578_v59 = vld [vmem:[%s1863_s28 + $0x1c4] ss:$16 sps:$4 sm:$0xff]   ;;  %v1580_v60 = vld [vmem:[%s1863_s28 + $0x1cc] ss:$16 sps:$4 sm:$0xff]   ;;  %v1582_v61 = vld [vmem:[%s1863_s28 + $0x1c0] ss:$16 sps:$4 sm:$0xff]  }
  0x46   : > { %1062 = vmatprep.mubr.bf16.mxu0 %v237_v52  ;;  %1144 = vmatprep.mubr.bf16.mxu1 %v237_v52  ;;  %v1583_v62 = vld [vmem:[%s1863_s28 + $0x1c8] ss:$16 sps:$4 sm:$0xff]   ;;  %v1584_v63 = vld [vmem:[%s1863_s28 + $0x1e4] ss:$16 sps:$4 sm:$0xff]   ;;  %v1586_v0 = vld [vmem:[%s1863_s28 + $0x1ec] ss:$16 sps:$4 sm:$0xff]  }
  0x47   : > { %1041 = vmatpush1.bf16.msra.mxu0 %v1528_v22  ;;  %1123 = vmatpush1.bf16.msra.mxu1 %v1529_v23  ;;  %v1945_v1 = vld [vmem:[%s1923_s29 + $0x8] sm:$0xff]  ;;  %v1588_v2 = vld [vmem:[%s1863_s28 + $0x1e0] ss:$16 sps:$4 sm:$0xff]   ;;  %v1593_v4 = vld [vmem:[%s1863_s28 + $0x204] ss:$16 sps:$4 sm:$0xff]  }
  0x48   : > { %1042 = vmatprep.subr.bf16.mxu0 %v1530_v24  ;;  %1124 = vmatprep.subr.bf16.mxu1 %v1532_v25  ;;  %v1589_v3 = vld [vmem:[%s1863_s28 + $0x1e8] ss:$16 sps:$4 sm:$0xff]   ;;  %v1596_v5 = vld [vmem:[%s1863_s28 + $0x20c] ss:$16 sps:$4 sm:$0xff]   ;;  %v233_v6 = vcombine.high %v1945_v1, %v1945_v1  ;;  %v1591_v8 = vld [vmem:[%s1863_s28 + $0x200] ss:$16 sps:$4 sm:$0xff]  }
  0x49   : > { %v1594_v9 = vld [vmem:[%s1863_s28 + $0x208] ss:$16 sps:$4 sm:$0xff]   ;;  %v1599_v10 = vld [vmem:[%s1863_s28 + $0x224] ss:$16 sps:$4 sm:$0xff]   ;;  %v1602_v11 = vld [vmem:[%s1863_s28 + $0x22c] ss:$16 sps:$4 sm:$0xff]  }
  0x4a   : > { %v239_v12 = vpack.c.bf16 %v233_v6, %v233_v6  ;;  %v1597_v13 = vld [vmem:[%s1863_s28 + $0x220] ss:$16 sps:$4 sm:$0xff]   ;;  %v1600_v14 = vld [vmem:[%s1863_s28 + $0x228] ss:$16 sps:$4 sm:$0xff]   ;;  %v1605_v15 = vld [vmem:[%s1863_s28 + $0x244] ss:$16 sps:$4 sm:$0xff]  }
  0x4b   : > { %1043 = vmatpush1.bf16.msra.mxu0 %v1534_v26  ;;  %1125 = vmatpush1.bf16.msra.mxu1 %v1535_v27  ;;  %v1608_v16 = vld [vmem:[%s1863_s28 + $0x24c] ss:$16 sps:$4 sm:$0xff]   ;;  %v1603_v17 = vld [vmem:[%s1863_s28 + $0x240] ss:$16 sps:$4 sm:$0xff]   ;;  %v1606_v18 = vld [vmem:[%s1863_s28 + $0x248] ss:$16 sps:$4 sm:$0xff]  }
  0x4c   : > { %1044 = vmatprep.subr.bf16.mxu0 %v1536_v28  ;;  %1126 = vmatprep.subr.bf16.mxu1 %v1538_v29  ;;  %v1611_v19 = vld [vmem:[%s1863_s28 + $0x264] ss:$16 sps:$4 sm:$0xff]   ;;  %v1614_v20 = vld [vmem:[%s1863_s28 + $0x26c] ss:$16 sps:$4 sm:$0xff]   ;;  %v1609_v21 = vld [vmem:[%s1863_s28 + $0x260] ss:$16 sps:$4 sm:$0xff]  }
  0x4d   : > { %v1612_v22 = vld [vmem:[%s1863_s28 + $0x268] ss:$16 sps:$4 sm:$0xff]   ;;  %v1617_v23 = vld [vmem:[%s1863_s28 + $0x284] ss:$16 sps:$4 sm:$0xff]   ;;  %v1620_v24 = vld [vmem:[%s1863_s28 + $0x28c] ss:$16 sps:$4 sm:$0xff]  }
  0x4e   : > { %v1615_v25 = vld [vmem:[%s1863_s28 + $0x280] ss:$16 sps:$4 sm:$0xff]   ;;  %v1618_v26 = vld [vmem:[%s1863_s28 + $0x288] ss:$16 sps:$4 sm:$0xff]   ;;  %v1623_v27 = vld [vmem:[%s1863_s28 + $0x2a4] ss:$16 sps:$4 sm:$0xff]  }
  0x4f   : > { %1045 = vmatpush1.bf16.msra.mxu0 %v1540_v30  ;;  %1127 = vmatpush1.bf16.msra.mxu1 %v1541_v31  ;;  %v1626_v28 = vld [vmem:[%s1863_s28 + $0x2ac] ss:$16 sps:$4 sm:$0xff]   ;;  %v1621_v29 = vld [vmem:[%s1863_s28 + $0x2a0] ss:$16 sps:$4 sm:$0xff]   ;;  %v1624_v30 = vld [vmem:[%s1863_s28 + $0x2a8] ss:$16 sps:$4 sm:$0xff]  }
  0x50   : > { %1046 = vmatprep.subr.bf16.mxu0 %v1542_v32  ;;  %1128 = vmatprep.subr.bf16.mxu1 %v1544_v33  ;;  %v1629_v31 = vld [vmem:[%s1863_s28 + $0x2c4] ss:$16 sps:$4 sm:$0xff]   ;;  %v1632_v32 = vld [vmem:[%s1863_s28 + $0x2cc] ss:$16 sps:$4 sm:$0xff]   ;;  %v1627_v33 = vld [vmem:[%s1863_s28 + $0x2c0] ss:$16 sps:$4 sm:$0xff]  }
  0x51   : > { %v1648_v46 = vld [vmem:[%s1863_s28 + $0x328] ss:$16 sps:$4 sm:$0xff]   ;;  %v1653_v47 = vld [vmem:[%s1863_s28 + $0x344] ss:$16 sps:$4 sm:$0xff]   ;;  %v1662_v52 = vld [vmem:[%s1863_s28 + $0x36c] ss:$16 sps:$4 sm:$0xff]  }
  0x52   : > { %v1681_v6 = vld [vmem:[%s1863_s28 + $0x3e0] ss:$16 sps:$4 sm:$0xff]  }
  0x53   : > { %1047 = vmatpush1.bf16.msra.mxu0 %v1546_v34  ;;  %1129 = vmatpush1.bf16.msra.mxu1 %v1547_v35  ;;  %v1630_v34 = vld [vmem:[%s1863_s28 + $0x2c8] ss:$16 sps:$4 sm:$0xff]   ;;  %v1635_v35 = vld [vmem:[%s1863_s28 + $0x2e4] ss:$16 sps:$4 sm:$0xff]  }
  0x54   : > { %1048 = vmatprep.subr.bf16.mxu0 %v1548_v36  ;;  %1130 = vmatprep.subr.bf16.mxu1 %v1550_v37  ;;  %v1638_v36 = vld [vmem:[%s1863_s28 + $0x2ec] ss:$16 sps:$4 sm:$0xff]   ;;  %v1633_v37 = vld [vmem:[%s1863_s28 + $0x2e0] ss:$16 sps:$4 sm:$0xff]  }
  0x57   : > { %1049 = vmatpush1.bf16.msra.mxu0 %v1552_v38  ;;  %1131 = vmatpush1.bf16.msra.mxu1 %v1553_v39  ;;  %v1636_v38 = vld [vmem:[%s1863_s28 + $0x2e8] ss:$16 sps:$4 sm:$0xff]   ;;  %v1641_v39 = vld [vmem:[%s1863_s28 + $0x304] ss:$16 sps:$4 sm:$0xff]  }
  0x58   : > { %1050 = vmatprep.subr.bf16.mxu0 %v1554_v40  ;;  %1132 = vmatprep.subr.bf16.mxu1 %v1556_v41  ;;  %v1644_v40 = vld [vmem:[%s1863_s28 + $0x30c] ss:$16 sps:$4 sm:$0xff]   ;;  %v1639_v41 = vld [vmem:[%s1863_s28 + $0x300] ss:$16 sps:$4 sm:$0xff]  }
  0x5b   : > { %1051 = vmatpush1.bf16.msra.mxu0 %v1558_v42  ;;  %1133 = vmatpush1.bf16.msra.mxu1 %v1559_v43  ;;  %v1642_v42 = vld [vmem:[%s1863_s28 + $0x308] ss:$16 sps:$4 sm:$0xff]   ;;  %v1647_v43 = vld [vmem:[%s1863_s28 + $0x324] ss:$16 sps:$4 sm:$0xff]  }
  0x5c   : > { %1052 = vmatprep.subr.bf16.mxu0 %v1560_v44  ;;  %1134 = vmatprep.subr.bf16.mxu1 %v1562_v45  ;;  %v1650_v44 = vld [vmem:[%s1863_s28 + $0x32c] ss:$16 sps:$4 sm:$0xff]   ;;  %v1645_v45 = vld [vmem:[%s1863_s28 + $0x320] ss:$16 sps:$4 sm:$0xff]  }
  0x5f   : > { %1053 = vmatpush1.bf16.msra.mxu0 %v1564_v48  ;;  %1135 = vmatpush1.bf16.msra.mxu1 %v1565_v49  ;;  %v1656_v48 = vld [vmem:[%s1863_s28 + $0x34c] ss:$16 sps:$4 sm:$0xff]   ;;  %v1651_v49 = vld [vmem:[%s1863_s28 + $0x340] ss:$16 sps:$4 sm:$0xff]  }
  0x60   : > { %1054 = vmatprep.subr.bf16.mxu0 %v1566_v50  ;;  %1136 = vmatprep.subr.bf16.mxu1 %v1568_v51  ;;  %v1654_v50 = vld [vmem:[%s1863_s28 + $0x348] ss:$16 sps:$4 sm:$0xff]   ;;  %v1659_v51 = vld [vmem:[%s1863_s28 + $0x364] ss:$16 sps:$4 sm:$0xff]  }
  0x63   : > { %1055 = vmatpush1.bf16.msra.mxu0 %v1570_v53  ;;  %1137 = vmatpush1.bf16.msra.mxu1 %v1571_v54  ;;  %v1657_v53 = vld [vmem:[%s1863_s28 + $0x360] ss:$16 sps:$4 sm:$0xff]   ;;  %v1660_v54 = vld [vmem:[%s1863_s28 + $0x368] ss:$16 sps:$4 sm:$0xff]  }
  0x64   : > { %1056 = vmatprep.subr.bf16.mxu0 %v1572_v55  ;;  %1138 = vmatprep.subr.bf16.mxu1 %v1574_v56  ;;  %v1665_v55 = vld [vmem:[%s1863_s28 + $0x384] ss:$16 sps:$4 sm:$0xff]   ;;  %v1668_v56 = vld [vmem:[%s1863_s28 + $0x38c] ss:$16 sps:$4 sm:$0xff]  }
  0x67   : > { %1057 = vmatpush1.bf16.msra.mxu0 %v1576_v57  ;;  %1139 = vmatpush1.bf16.msra.mxu1 %v1577_v58  ;;  %v1663_v57 = vld [vmem:[%s1863_s28 + $0x380] ss:$16 sps:$4 sm:$0xff]   ;;  %v1666_v58 = vld [vmem:[%s1863_s28 + $0x388] ss:$16 sps:$4 sm:$0xff]  }
  0x68   : > { %1058 = vmatprep.subr.bf16.mxu0 %v1578_v59  ;;  %1140 = vmatprep.subr.bf16.mxu1 %v1580_v60  ;;  %v1671_v59 = vld [vmem:[%s1863_s28 + $0x3a4] ss:$16 sps:$4 sm:$0xff]   ;;  %v1674_v60 = vld [vmem:[%s1863_s28 + $0x3ac] ss:$16 sps:$4 sm:$0xff]  }
  0x6b   : > { %1059 = vmatpush1.bf16.msra.mxu0 %v1582_v61  ;;  %1141 = vmatpush1.bf16.msra.mxu1 %v1583_v62  ;;  %v1669_v61 = vld [vmem:[%s1863_s28 + $0x3a0] ss:$16 sps:$4 sm:$0xff]   ;;  %v1672_v62 = vld [vmem:[%s1863_s28 + $0x3a8] ss:$16 sps:$4 sm:$0xff]  }
  0x6c   : > { %1060 = vmatprep.subr.bf16.mxu0 %v1584_v63  ;;  %1142 = vmatprep.subr.bf16.mxu1 %v1586_v0  ;;  %v1677_v63 = vld [vmem:[%s1863_s28 + $0x3c4] ss:$16 sps:$4 sm:$0xff]   ;;  %v1680_v0 = vld [vmem:[%s1863_s28 + $0x3cc] ss:$16 sps:$4 sm:$0xff]  }
  0x6f   : > { %1061 = vmatpush1.bf16.msra.mxu0 %v1588_v2  ;;  %1143 = vmatpush1.bf16.msra.mxu1 %v1589_v3  ;;  %v1675_v2 = vld [vmem:[%s1863_s28 + $0x3c0] ss:$16 sps:$4 sm:$0xff]   ;;  %v1678_v3 = vld [vmem:[%s1863_s28 + $0x3c8] ss:$16 sps:$4 sm:$0xff]  }
  0x70   : > { %1071 = vmatprep.subr.bf16.mxu0 %v1593_v4  ;;  %1153 = vmatprep.subr.bf16.mxu1 %v1596_v5  ;;  %v1683_v4 = vld [vmem:[%s1863_s28 + $0x3e4] ss:$16 sps:$4 sm:$0xff]   ;;  %v1686_v5 = vld [vmem:[%s1863_s28 + $0x3ec] ss:$16 sps:$4 sm:$0xff]  }
  0x72   : > { %1063 = vmatmul.mubr.bf16.vlgmr.msra.gmra.mrb[0].mxu0 %v236_v7  ;;  %1145 = vmatmul.mubr.bf16.vlgmr.msra.gmra.mrb[0].mxu1 %v236_v7  ;;  %v1684_v7 = vld [vmem:[%s1863_s28 + $0x3e8] ss:$16 sps:$4 sm:$0xff]  }
  0x73   : > { %1072 = vmatpush1.bf16.msra.mxu0 %v1591_v8  ;;  %1154 = vmatpush1.bf16.msra.mxu1 %v1594_v9  ;;  %v238_v8 = vpack.c.bf16 %v1945_v1, %v1945_v1  ;;  %v370_v9 = vlaneseq }
  0x74   : > { %1073 = vmatprep.subr.bf16.mxu0 %v1599_v10  ;;  %1155 = vmatprep.subr.bf16.mxu1 %v1602_v11 }
  0x75   : > { %1103 = vmatprep.mubr.bf16.mxu0 %v239_v12  ;;  %1185 = vmatprep.mubr.bf16.mxu1 %v239_v12  ;;  %v371_v10 = vshrl.u32 %v370_v9, 7 }
  0x77   : > { %1074 = vmatpush1.bf16.msra.mxu0 %v1597_v13  ;;  %1156 = vmatpush1.bf16.msra.mxu1 %v1600_v14  ;;  %v372_v11 = vsub.s32 0, %v371_v10  ;;  %v380_v12 = vsub.s32 2, %v371_v10  ;;  %v368_v13 = vld [vmem:[%s222_s6] sm:$0xf]  ;;  %v376_v14 = vsub.s32 1, %v371_v10 }
  0x78   : > { %1075 = vmatprep.subr.bf16.mxu0 %v1605_v15  ;;  %1157 = vmatprep.subr.bf16.mxu1 %v1608_v16  ;;  %v384_v15 = vsub.s32 3, %v371_v10 }
  0x79   : > { %v373_v16 = vrot.slane %v368_v13, %v372_v11  ;;  %v377_v1 = vrot.slane %v368_v13, %v376_v14 }
  0x7b   : > { %1076 = vmatpush1.bf16.msra.mxu0 %v1603_v17  ;;  %1158 = vmatpush1.bf16.msra.mxu1 %v1606_v18  ;;  %v381_v17 = vrot.slane %v368_v13, %v380_v12  ;;  %v385_v18 = vrot.slane %v368_v13, %v384_v15 }
  0x7c   : > { %1077 = vmatprep.subr.bf16.mxu0 %v1611_v19  ;;  %1159 = vmatprep.subr.bf16.mxu1 %v1614_v20 }
  0x7f   : > { %1078 = vmatpush1.bf16.msra.mxu0 %v1609_v21  ;;  %1160 = vmatpush1.bf16.msra.mxu1 %v1612_v22 }
  0x80   : > { %1079 = vmatprep.subr.bf16.mxu0 %v1617_v23  ;;  %1161 = vmatprep.subr.bf16.mxu1 %v1620_v24 }
  0x83   : > { %1080 = vmatpush1.bf16.msra.mxu0 %v1615_v25  ;;  %1162 = vmatpush1.bf16.msra.mxu1 %v1618_v26 }
  0x84   : > { %1081 = vmatprep.subr.bf16.mxu0 %v1623_v27  ;;  %1163 = vmatprep.subr.bf16.mxu1 %v1626_v28 }
  0x87   : > { %1082 = vmatpush1.bf16.msra.mxu0 %v1621_v29  ;;  %1164 = vmatpush1.bf16.msra.mxu1 %v1624_v30 }
  0x88   : > { %1083 = vmatprep.subr.bf16.mxu0 %v1629_v31  ;;  %1165 = vmatprep.subr.bf16.mxu1 %v1632_v32 }
  0x8b   : > { %1084 = vmatpush1.bf16.msra.mxu0 %v1627_v33  ;;  %1166 = vmatpush1.bf16.msra.mxu1 %v1630_v34 }
  0x8c   : > { %1085 = vmatprep.subr.bf16.mxu0 %v1635_v35  ;;  %1167 = vmatprep.subr.bf16.mxu1 %v1638_v36 }
  0x8f   : > { %1086 = vmatpush1.bf16.msra.mxu0 %v1633_v37  ;;  %1168 = vmatpush1.bf16.msra.mxu1 %v1636_v38 }
  0x90   : > { %1087 = vmatprep.subr.bf16.mxu0 %v1641_v39  ;;  %1169 = vmatprep.subr.bf16.mxu1 %v1644_v40 }
  0x93   : > { %1088 = vmatpush1.bf16.msra.mxu0 %v1639_v41  ;;  %1170 = vmatpush1.bf16.msra.mxu1 %v1642_v42 }
  0x94   : > { %1089 = vmatprep.subr.bf16.mxu0 %v1647_v43  ;;  %1171 = vmatprep.subr.bf16.mxu1 %v1650_v44 }
  0x97   : > { %1090 = vmatpush1.bf16.msra.mxu0 %v1645_v45  ;;  %1172 = vmatpush1.bf16.msra.mxu1 %v1648_v46 }
  0x98   : > { %1091 = vmatprep.subr.bf16.mxu0 %v1653_v47  ;;  %1173 = vmatprep.subr.bf16.mxu1 %v1656_v48 }
  0x9b   : > { %1092 = vmatpush1.bf16.msra.mxu0 %v1651_v49  ;;  %1174 = vmatpush1.bf16.msra.mxu1 %v1654_v50 }
  0x9c   : > { %1093 = vmatprep.subr.bf16.mxu0 %v1659_v51  ;;  %1175 = vmatprep.subr.bf16.mxu1 %v1662_v52 }
  0x9f   : > { %1094 = vmatpush1.bf16.msra.mxu0 %v1657_v53  ;;  %1176 = vmatpush1.bf16.msra.mxu1 %v1660_v54 }
  0xa0   : > { %1095 = vmatprep.subr.bf16.mxu0 %v1665_v55  ;;  %1177 = vmatprep.subr.bf16.mxu1 %v1668_v56 }
  0xa3   : > { %1096 = vmatpush1.bf16.msra.mxu0 %v1663_v57  ;;  %1178 = vmatpush1.bf16.msra.mxu1 %v1666_v58 }
  0xa4   : > { %1097 = vmatprep.subr.bf16.mxu0 %v1671_v59  ;;  %1179 = vmatprep.subr.bf16.mxu1 %v1674_v60 }
  0xa7   : > { %1098 = vmatpush1.bf16.msra.mxu0 %v1669_v61  ;;  %1180 = vmatpush1.bf16.msra.mxu1 %v1672_v62 }
  0xa8   : > { %1099 = vmatprep.subr.bf16.mxu0 %v1677_v63  ;;  %1181 = vmatprep.subr.bf16.mxu1 %v1680_v0 }
  0xab   : > { %1100 = vmatpush1.bf16.msra.mxu0 %v1675_v2  ;;  %1182 = vmatpush1.bf16.msra.mxu1 %v1678_v3 }
  0xac   : > { %1101 = vmatprep.subr.bf16.mxu0 %v1683_v4  ;;  %1183 = vmatprep.subr.bf16.mxu1 %v1686_v5 }
  0xaf   : > { %1102 = vmatpush1.bf16.msra.mxu0 %v1681_v6  ;;  %1184 = vmatpush1.bf16.msra.mxu1 %v1684_v7 }
  0xb2   : > { %1104 = vmatmul.mubr.bf16.vlgmr.msra.gmra.mrb[0].mxu0 %v238_v8  ;;  %1186 = vmatmul.mubr.bf16.vlgmr.msra.gmra.mrb[0].mxu1 %v238_v8 }
 0x185   : > { %v1105_v19 = vpop.f32.mrb[0].mxu0  ;;  %v1187_v20 = vpop.f32.mrb[0].mxu1 }
 0x186   : > { %v1441_v21 = vadd.f32 %v1105_v19, %v373_v16  ;;  %v1443_v22 = vadd.f32 %v1187_v20, %v381_v17  ;;  %v1107_v23 = vpop.f32.mrb[1].mxu0  ;;  %v1189_v24 = vpop.f32.mrb[1].mxu1 }
 0x187   : > { %v1442_v25 = vadd.f32 %v1107_v23, %v377_v1  ;;  %v1444_v26 = vadd.f32 %v1189_v24, %v385_v18  ;;  %v1109_v27 = vpop.f32.mrb[2].mxu0  ;;  %v1191_v28 = vpop.f32.mrb[2].mxu1 }
 0x188   : > { %v1110_v29 = vpop.f32.mrb[3].mxu0  ;;  %v1192_v30 = vpop.f32.mrb[3].mxu1 }
 0x189   : > { %v1198_v31 = vcombine.low %v1441_v21, %v1442_v25  ;;  %v1199_v32 = vcombine.low %v1443_v22, %v1444_v26 }
 0x18b   : > { %1202 = vst [vmem:[%s227_s9] sm:$0xff] %v1198_v31  ;;  %1203 = vst [vmem:[%s227_s9 + $0x8] sm:$0xff] %v1199_v32 }
 0x18c PF: > { %p13_p8 = scmp.ge.s32.totalorder %s1799_s17, 4   ;;  %s2046_s12 = smov %s1744_s13 }
 0x18d   : > { %s2047_s13 = smov %s1748_s14  ;;  %s2048_s14 = smov %s1809_s20 }
 0x18e   : > { %s2049_s15 = smov %s1799_s17  ;;  %15 = sbr.rel (!%p13_p8) target bundleno = 3 (0x3), region = 78 }
 0x195   :  { %1225 = vsyncpa [#allocation3], 1 }
 0x196   :  { %1227 = vsyncpa [#allocation3 + $0x1], 1 }

</bundles_post_ra>
